<compile_context>
chip_gen: v6e
topology: v6e:2x2x1
jax: 0.10.0
libtpu: 0.0.40
codegen_flags: <defaults>
</compile_context>

<pallas_src>
import math

import jax
import jax.numpy as jnp
from jax.experimental import pallas as pl
from jax.experimental.pallas import tpu as pltpu


def _round_up(x, m):
    return ((x + m - 1) // m) * m


def _vmem_limit_bytes():
    """~75% of the detected per-core VMEM, capped at 96 MiB.

    -> ~96 MiB on v5e/v6e (128 MiB VMEM), ~48 MiB on v7x (64 MiB / TC).
    """
    cap = 128 * 1024 * 1024
    try:
        cap = int(pltpu.get_tpu_info().vmem_capacity_bytes)
    except Exception:
        pass
    return min((cap * 3) // 4, 96 * 1024 * 1024)


def gcn_kernel(adj_ref, dis_row_ref, support_ref, b_ref, o_ref):
    """One grid step = one block of output rows.

    adj_ref     : VMEM [bm, K] int32   neighbor indices for this row block
                                        (value == N selects the zero-pad row)
    dis_row_ref : VMEM [bm, K] f32     dis[adj[:, 0], :] for this row block
    support_ref : VMEM [N, Fp] f32     x @ weight, F_out zero-padded to Fp
                                        (grid-invariant, resident)
    b_ref       : VMEM [1, Fp] f32     bias (zero-padded, resident)
    o_ref       : VMEM [bm, Fp]        output block (lane-dense store)
    """
    n_nodes = support_ref.shape[0]
    bm, k_nbrs = adj_ref.shape

    adj = adj_ref[...]                                               # [bm, K] int32
    dis_row = dis_row_ref[...]                                       # [bm, K] f32
    node_ids = jax.lax.broadcasted_iota(jnp.int32, (bm, n_nodes), 1)

    # Dense selection matrix: sel[m, n] = sum_k dis_row[m, k] * (adj[m, k] == n).
    # adj[m, k] == N (the appended zero row) matches no column -> contributes
    # zero, exactly like gathering the zero row in the reference.
    # compare + select + add per k (no cast/mul) keeps the VALU slot lean.
    sel = jnp.zeros((bm, n_nodes), jnp.float32)
    for k in range(k_nbrs):                                          # K small, static
        eq_k = adj[:, k:k + 1] == node_ids                           # [bm, N] bool
        d_k = jnp.broadcast_to(dis_row[:, k:k + 1], (bm, n_nodes))   # lane bcast, hoisted
        sel = sel + jnp.where(eq_k, d_k, 0.0)

    # output = sel @ support + bias  (single MXU matmul, lane-dense store).
    out = jnp.dot(sel, support_ref[...],
                  preferred_element_type=jnp.float32) + b_ref[...]
    o_ref[...] = out.astype(o_ref.dtype)


def graph_convolution(x, adj, dis, weight, bias, *, block_m=512):
    """Pallas wrapper.

    x:[N,F_in] f32   adj:[M,K] int   dis:[N,K] f32
    weight:[F_in,F_out] f32   bias:[F_out] f32   ->   [M, F_out] f32
    """
    x = x.astype(jnp.float32)
    dis = dis.astype(jnp.float32)
    N, _f_in = x.shape
    M, K = adj.shape
    f_in, f_out = weight.shape
    adj = adj.astype(jnp.int32)

    # Lane-dense output: pad F_out to a multiple of 128 (zero cols sliced off).
    f_pad = _round_up(f_out, 128)
    w_p = jnp.zeros((f_in, f_pad), jnp.float32).at[:, :f_out].set(
        weight.astype(jnp.float32))
    b_p = jnp.zeros((1, f_pad), jnp.float32).at[0, :f_out].set(
        bias.astype(jnp.float32))

    # Hoisted work (done once, outside the row-block grid):
    #   support = x @ w      (the reference's torch.mm(input, weight))
    #   dis_row = dis[adj[:, 0]]   (exact gather, bit-identical to reference)
    support_p = jnp.dot(x, w_p, preferred_element_type=jnp.float32)   # [N, Fp]
    dis_row = jnp.take(dis, adj[:, 0], axis=0)                        # [M, K]

    # Row blocking: sublane-aligned, and sized so the grid has >= 2 steps when
    # M allows (lets "parallel" shard across v7x's two TensorCores).
    bm = max(8, min(block_m, _round_up(pl.cdiv(M, 2), 8)))
    m_pad = _round_up(M, bm)

    # Pad rows: adj -> N (zero-pad row, matches nothing), dis_row -> 0.
    adj_p = jnp.full((m_pad, K), N, dtype=jnp.int32).at[:M].set(adj)
    dis_row_p = jnp.zeros((m_pad, K), jnp.float32).at[:M].set(dis_row)

    grid = (m_pad // bm,)

    out = pl.pallas_call(
        gcn_kernel,
        out_shape=jax.ShapeDtypeStruct((m_pad, f_pad), jnp.float32),
        grid_spec=pltpu.PrefetchScalarGridSpec(
            num_scalar_prefetch=0,
            grid=grid,
            in_specs=[
                pl.BlockSpec((bm, K), lambda i: (i, 0)),        # adj row-block
                pl.BlockSpec((bm, K), lambda i: (i, 0)),        # dis_row row-block
                pl.BlockSpec((N, f_pad), lambda i: (0, 0)),     # support (resident)
                pl.BlockSpec((1, f_pad), lambda i: (0, 0)),     # bias (resident)
            ],
            out_specs=pl.BlockSpec((bm, f_pad), lambda i: (i, 0)),
        ),
        compiler_params=pltpu.CompilerParams(
            dimension_semantics=("parallel",),       # megacore-shardable on v7x
            vmem_limit_bytes=_vmem_limit_bytes(),
        ),
    )(adj_p, dis_row_p, support_p, b_p)

    return out[:M, :f_out]


def reference(x, adj, dis, weight, bias):
    """Pure-JAX reference matching the PyTorch forward exactly."""
    support = x @ weight
    add_support = jnp.concatenate(
        [support, jnp.zeros((1, support.shape[1]), support.dtype)], axis=0)
    gathered = add_support[adj]                 # [M, K, F_out]
    w = dis[adj[:, 0]][:, :, None]              # [M, K, 1]
    return (gathered * w).sum(axis=1) + bias


if __name__ == "__main__":
    # Small deterministic problem: N=8 nodes, F_in=16, F_out=32, K=4 neighbors.
    N, f_in, f_out, K = 8, 16, 32, 4
    M = N

    key = jax.random.PRNGKey(0)
    k1, k2, k3, k4, k5 = jax.random.split(key, 5)

    # Parameters initialized like reset_parameters(): uniform(-stdv, stdv).
    stdv = 1.0 / math.sqrt(f_out)
    weight = jax.random.uniform(k2, (f_in, f_out), jnp.float32, -stdv, stdv)
    bias = jax.random.uniform(k3, (f_out,), jnp.float32, -stdv, stdv)

    x = jax.random.normal(k1, (N, f_in), dtype=jnp.float32)
    # Neighbor indices in [0, N]; value N selects the appended zero row.
    adj = jax.random.randint(k4, (M, K), 0, N + 1, dtype=jnp.int32)
    # adj[:, 0] indexes `dis`, so keep it a valid node id (self index).
    adj = adj.at[:, 0].set(jnp.arange(M, dtype=jnp.int32))
    dis = jax.random.uniform(k5, (N, K), jnp.float32)

    out = graph_convolution(x, adj, dis, weight, bias)
    out = jax.block_until_ready(out)

    ref = reference(x, adj, dis, weight, bias)
    assert out.shape == (M, f_out) and out.dtype == jnp.float32
    assert jnp.allclose(out, ref, atol=1e-5, rtol=1e-5), (out, ref)

    print("KERNEL_OK")
</pallas_src>

<mosaic_0001>
module attributes {stable_mosaic.version = 11 : i64} {
  func.func @gcn_kernel(%arg0: i32, %arg1: memref<8x4xi32, #tpu.memory_space<vmem>>, %arg2: memref<8x4xf32, #tpu.memory_space<vmem>>, %arg3: memref<8x128xf32, #tpu.memory_space<vmem>>, %arg4: memref<1x128xf32, #tpu.memory_space<vmem>>, %arg5: memref<8x128xf32, #tpu.memory_space<vmem>>) attributes {dimension_semantics = [#tpu.dimension_semantics<parallel>], iteration_bounds = array<i64: 1>, scalar_prefetch = 0 : i64, scratch_operands = 0 : i64, tpu.core_type = #tpu.core_type<tc>, window_params = [{transform_indices = @transform_0, window_bounds = array<i64: 8, 4>}, {transform_indices = @transform_1, window_bounds = array<i64: 8, 4>}, {pipeline_mode = #tpu.pipeline_mode<synchronous>, transform_indices = @transform_2, window_bounds = array<i64: 8, 128>}, {pipeline_mode = #tpu.pipeline_mode<synchronous>, transform_indices = @transform_3, window_bounds = array<i64: 1, 128>}, {transform_indices = @transform_4, window_bounds = array<i64: 8, 128>}]} {
    %c0 = arith.constant 0 : index
    %c0_0 = arith.constant 0 : index
    %0 = vector.load %arg1[%c0, %c0_0] : memref<8x4xi32, #tpu.memory_space<vmem>>, vector<8x4xi32>
    %c0_1 = arith.constant 0 : index
    %c0_2 = arith.constant 0 : index
    %1 = vector.load %arg2[%c0_1, %c0_2] : memref<8x4xf32, #tpu.memory_space<vmem>>, vector<8x4xf32>
    %2 = tpu.iota {dimensions = array<i32: 1>} : vector<8x8xi32>
    %cst = arith.constant 0.000000e+00 : f32
    %3 = vector.broadcast %cst : f32 to vector<8x8xf32>
    %4 = vector.extract_strided_slice %0 {offsets = [0, 0], sizes = [8, 1], strides = [1, 1]} : vector<8x4xi32> to vector<8x1xi32>
    %5 = vector.broadcast %4 : vector<8x1xi32> to vector<8x8xi32>
    %6 = arith.cmpi eq, %5, %2 : vector<8x8xi32>
    %7 = vector.extract_strided_slice %1 {offsets = [0, 0], sizes = [8, 1], strides = [1, 1]} : vector<8x4xf32> to vector<8x1xf32>
    %8 = vector.shape_cast %7 : vector<8x1xf32> to vector<8x1xf32>
    %9 = vector.broadcast %8 : vector<8x1xf32> to vector<8x8xf32>
    %cst_3 = arith.constant 0.000000e+00 : f32
    %10 = vector.broadcast %cst_3 : f32 to vector<8x8xf32>
    %11 = arith.select %6, %9, %10 : vector<8x8xi1>, vector<8x8xf32>
    %12 = arith.addf %3, %11 : vector<8x8xf32>
    %13 = vector.extract_strided_slice %0 {offsets = [0, 1], sizes = [8, 1], strides = [1, 1]} : vector<8x4xi32> to vector<8x1xi32>
    %14 = vector.broadcast %13 : vector<8x1xi32> to vector<8x8xi32>
    %15 = arith.cmpi eq, %14, %2 : vector<8x8xi32>
    %16 = vector.extract_strided_slice %1 {offsets = [0, 1], sizes = [8, 1], strides = [1, 1]} : vector<8x4xf32> to vector<8x1xf32>
    %17 = vector.shape_cast %16 : vector<8x1xf32> to vector<8x1xf32>
    %18 = vector.broadcast %17 : vector<8x1xf32> to vector<8x8xf32>
    %cst_4 = arith.constant 0.000000e+00 : f32
    %19 = vector.broadcast %cst_4 : f32 to vector<8x8xf32>
    %20 = arith.select %15, %18, %19 : vector<8x8xi1>, vector<8x8xf32>
    %21 = arith.addf %12, %20 : vector<8x8xf32>
    %22 = vector.extract_strided_slice %0 {offsets = [0, 2], sizes = [8, 1], strides = [1, 1]} : vector<8x4xi32> to vector<8x1xi32>
    %23 = vector.broadcast %22 : vector<8x1xi32> to vector<8x8xi32>
    %24 = arith.cmpi eq, %23, %2 : vector<8x8xi32>
    %25 = vector.extract_strided_slice %1 {offsets = [0, 2], sizes = [8, 1], strides = [1, 1]} : vector<8x4xf32> to vector<8x1xf32>
    %26 = vector.shape_cast %25 : vector<8x1xf32> to vector<8x1xf32>
    %27 = vector.broadcast %26 : vector<8x1xf32> to vector<8x8xf32>
    %cst_5 = arith.constant 0.000000e+00 : f32
    %28 = vector.broadcast %cst_5 : f32 to vector<8x8xf32>
    %29 = arith.select %24, %27, %28 : vector<8x8xi1>, vector<8x8xf32>
    %30 = arith.addf %21, %29 : vector<8x8xf32>
    %31 = vector.extract_strided_slice %0 {offsets = [0, 3], sizes = [8, 1], strides = [1, 1]} : vector<8x4xi32> to vector<8x1xi32>
    %32 = vector.broadcast %31 : vector<8x1xi32> to vector<8x8xi32>
    %33 = arith.cmpi eq, %32, %2 : vector<8x8xi32>
    %34 = vector.extract_strided_slice %1 {offsets = [0, 3], sizes = [8, 1], strides = [1, 1]} : vector<8x4xf32> to vector<8x1xf32>
    %35 = vector.shape_cast %34 : vector<8x1xf32> to vector<8x1xf32>
    %36 = vector.broadcast %35 : vector<8x1xf32> to vector<8x8xf32>
    %cst_6 = arith.constant 0.000000e+00 : f32
    %37 = vector.broadcast %cst_6 : f32 to vector<8x8xf32>
    %38 = arith.select %33, %36, %37 : vector<8x8xi1>, vector<8x8xf32>
    %39 = arith.addf %30, %38 : vector<8x8xf32>
    %c0_7 = arith.constant 0 : index
    %c0_8 = arith.constant 0 : index
    %40 = vector.load %arg3[%c0_7, %c0_8] : memref<8x128xf32, #tpu.memory_space<vmem>>, vector<8x128xf32>
    %cst_9 = arith.constant dense<0.000000e+00> : vector<8x128xf32>
    %41 = tpu.matmul %39, %40, %cst_9 {dimension_numbers = #tpu.dot_dimension_numbers<[1], [0], [0], [1], [0, 0, 1, 1], [], []>} : vector<8x8xf32>, vector<8x128xf32>, vector<8x128xf32> -> vector<8x128xf32>
    %c0_10 = arith.constant 0 : index
    %c0_11 = arith.constant 0 : index
    %42 = vector.load %arg4[%c0_10, %c0_11] : memref<1x128xf32, #tpu.memory_space<vmem>>, vector<1x128xf32>
    %43 = vector.broadcast %42 : vector<1x128xf32> to vector<8x128xf32>
    %44 = arith.addf %41, %43 : vector<8x128xf32>
    %c0_12 = arith.constant 0 : index
    %c0_13 = arith.constant 0 : index
    %45 = vector.load %arg5[%c0_12, %c0_13] : memref<8x128xf32, #tpu.memory_space<vmem>>, vector<8x128xf32>
    tpu.vector_store %arg5[%c0_12, %c0_13], %44 {strides = array<i32>} : memref<8x128xf32, #tpu.memory_space<vmem>>, vector<8x128xf32>,
    return
  }
  func.func @transform_0(%arg0: i32) -> (i32, i32) {
    %c0_i32 = arith.constant 0 : i32
    %c0_i32_0 = arith.constant 0 : i32
    return %arg0, %c0_i32 : i32, i32
  }
  func.func @transform_1(%arg0: i32) -> (i32, i32) {
    %c0_i32 = arith.constant 0 : i32
    %c0_i32_0 = arith.constant 0 : i32
    return %arg0, %c0_i32 : i32, i32
  }
  func.func @transform_2(%arg0: i32) -> (i32, i32) {
    %c0_i32 = arith.constant 0 : i32
    %c0_i32_0 = arith.constant 0 : i32
    %c0_i32_1 = arith.constant 0 : i32
    return %c0_i32, %c0_i32_0 : i32, i32
  }
  func.func @transform_3(%arg0: i32) -> (i32, i32) {
    %c0_i32 = arith.constant 0 : i32
    %c0_i32_0 = arith.constant 0 : i32
    %c0_i32_1 = arith.constant 0 : i32
    return %c0_i32, %c0_i32_0 : i32, i32
  }
  func.func @transform_4(%arg0: i32) -> (i32, i32) {
    %c0_i32 = arith.constant 0 : i32
    %c0_i32_0 = arith.constant 0 : i32
    return %arg0, %c0_i32 : i32, i32
  }
}

</mosaic_0001>

<bundles_post_ra>
// kernel: tpu_custom_call.1
= control target key start
LH: loop header
LB: loop body
LE: loop exit
PB: predicated region body
PF: predicated region fallthrough
CT: control target
= control target key end

     0   :  { %v206_v2 = vmov 0   ;;  %s253_s0 = inlined_call_operand.vmem [shape: s32[8,4], index: 0, kind: input, shape index: {}]   ;;  %s254_s1 = inlined_call_operand.vmem [shape: f32[8,4], index: 1, kind: input, shape index: {}]   ;;  %s255_s2 = inlined_call_operand.vmem [shape: f32[8,128], index: 2, kind: input, shape index: {}]   ;;  %s256_s3 = inlined_call_operand.vmem [shape: f32[1,128], index: 3, kind: input, shape index: {}]   ;;  %s257_s4 = inlined_call_operand.hbm [shape: f32[8,128], index: 4, kind: output, shape index: {}]  }
   0x1   :  { %v19_v0 = vld [vmem:[%s254_s1] sm:$0xff]  ;;  %178 = vset.pattern.permute.xlu1 %v206_v2  ;;  %176 = vset.pattern.permute.xlu0 %v206_v2 }
   0x2   :  { %v18_v1 = vld [vmem:[%s253_s0] sm:$0xff] }
   0x3   :  { %9 = vsyncpa [#allocation3], 0  ;;  %28 = vperm.xlu1 %178, %v19_v0   ;;  %23 = vperm.xlu0 %176, %v18_v1   ;;  %v207_v3 = vmov 1   ;;  %v208_v4 = vmov 2   ;;  %v209_v5 = vmov 3   ;;  %v210_v6 = vmov 0.0  }
   0x4   :  { %164 = vmatprep.subr.mxu0 %v210_v6  ;;  %v63_v7 = vld [vmem:[%s255_s2] sm:$0xff]  ;;  %vm211_vm0 = vmmov 0   ;;  %v20_v10 = vlaneseq  ;;  %vm71_vm5 = vcmask 64512   ;;  %s212_s20 = smov [#allocation2]  }
   0x5   :  { %165 = vmatpush3.msra.mxu0 %v63_v7  ;;  %166 = vmatprep.mubr.msk.f32.mxu0 %vm211_vm0, %v210_v6  ;;  %v160_v25 = vld [vmem:[%s256_s3] ss:$0 sm:$0xff]  ;;  %s152_s21 = sshll.u32 %s212_s20, 4  ;;  %s153_s21 = int_to_ptr.vmem [resolvable:$true] %s152_s21 }
   0x6   :  { %v21_v13 = vand.u32 127, %v20_v10  ;;  %s184_s22 = scalar_lea.vmem %s153_s21, 128  ;;  %p189_p1 = scmp.lt.s32.totalorder %s153_s21, %s153_s21 }
   0x7   :  { %179 = vset.pattern.permute.xlu1 %v207_v3  ;;  %177 = vset.pattern.permute.xlu0 %v207_v3  ;;  %p185_p0 = scmp.ne.s32.totalorder %s153_s21, %s184_s22  ;;  %p190_p2 = scmp.lt.s32.totalorder %s184_s22, %s184_s22 }
   0x8   :  { %38 = vperm.xlu1 %179, %v19_v0   ;;  %34 = vperm.xlu0 %177, %v18_v1  }
   0x9   :  { %p191_p3 = por %p190_p2, %p189_p1 }
   0xb   :  { %p192_p4 = pnand %p191_p3, %p185_p0 }
   0xc   :  { %180 = vset.pattern.permute.xlu1 %v208_v4  ;;  %181 = vset.pattern.permute.xlu0 %v208_v4 }
   0xd   :  { %44 = vperm.xlu1 %180, %v18_v1   ;;  %48 = vperm.xlu0 %181, %v19_v0  }
  0x11   :  { %182 = vset.pattern.permute.xlu1 %v209_v5  ;;  %183 = vset.pattern.permute.xlu0 %v209_v5 }
  0x12   :  { %54 = vperm.xlu1 %182, %v18_v1  }
  0x16   :  { %58 = vperm.xlu1 %182, %v19_v0  }
  0x7e   :  { %v29_v8 = vpop.permute.xlu1 %28  ;;  %v24_v9 = vpop.permute.xlu0 %23 }
  0x7f   :  { %vm25_vm2 = vcmp.eq.s32.totalorder %v24_v9, %v21_v13 }
  0x80   :  { %v31_v18 = vsel %vm25_vm2, %v29_v8, 0.0 }
  0x83   :  { %v39_v11 = vpop.permute.xlu1 %38  ;;  %v35_v12 = vpop.permute.xlu0 %34 }
  0x84   :  { %vm36_vm1 = vcmp.eq.s32.totalorder %v35_v12, %v21_v13 }
  0x85   :  { %v41_v16 = vsel %vm36_vm1, %v39_v11, 0.0 }
  0x86   :  { %v42_v20 = vadd.f32 %v41_v16, %v31_v18 }
  0x88   :  { %v45_v14 = vpop.permute.xlu1 %44  ;;  %v49_v15 = vpop.permute.xlu0 %48 }
  0x89   :  { %vm46_vm3 = vcmp.eq.s32.totalorder %v45_v14, %v21_v13 }
  0x8a   :  { %v51_v19 = vsel %vm46_vm3, %v49_v15, 0.0 }
  0x8b   :  { %v52_v21 = vadd.f32 %v51_v19, %v42_v20 }
  0x8d   :  { %v55_v17 = vpop.permute.xlu1 %54 }
  0x8e   :  { %vm56_vm4 = vcmp.eq.s32.totalorder %v55_v17, %v21_v13 }
  0x91   :  { %v59_v22 = vpop.permute.xlu1 %58 }
  0x92   :  { %v61_v23 = vsel %vm56_vm4, %v59_v22, 0.0 }
  0x93   :  { %v62_v24 = vadd.f32 %v61_v23, %v52_v21 }
  0x95   :  { %167 = vmatmul.mubr.msk.f32.vlgmr.msra.gmra.mxu0 %vm71_vm5, %v62_v24 }
 0x155   :  { %v141_v26 = vpop.f32.mrf.mxu0 }
 0x156   :  { %v142_v27 = vadd.f32 %v160_v25, %v141_v26 }
 0x157   :  { %v168_v28 = vpop.f32.mrf.mxu0 }
 0x158   :  { %145 = vst [vmem:[#allocation2] sm:$0xff] %v142_v27 }
 0x159   :  { %195 = shalt.err (!%p192_p4)
}
 0x15a   :  { %155 = dma.vmem_to_hbm [thread:$0]  %s153_s21, 128, %s257_s4, [#allocation3]  }
 0x15b   :  { %204 = dma.done.wait [#allocation3], 128  }
 0x15c   :  { %205 = vsyncadd [#allocation3], 4294967168 }
 0x15d   :  { %159 = vsyncpa [#allocation3], 1 }

</bundles_post_ra>
